<compile_context>
chip_gen: v7x
topology: tpu7x:2x2x1
jax: 0.10.0
libtpu: 0.0.40
codegen_flags: <defaults>
</compile_context>

<pallas_src>
import jax
import jax.numpy as jnp
from jax.experimental import pallas as pl
from jax.experimental.pallas import tpu as pltpu


_LANE = 128           # vreg lane width: batch's fast axis
_SUBLANE = 8          # vreg sublane height: tile sublane counts must be multiples of 8
_MAX_SUBLANES = 2048  # 2*2048*128*4B = 2 MiB x-tile per buffer; ~6 MiB total with
                      # double buffering -> safe under v5e/v6e/v7x scoped VMEM limits
                      # while already at ~85%+ of the HBM roofline.


def _affine_kernel(wb_ref, xt_ref, out_ref):
    """out = w0*x0 + w1*x1 + bc, batch dense on the (sublane, lane) axes."""
    w0 = wb_ref[0]                       # scalars from SMEM
    w1 = wb_ref[1]
    bc = wb_ref[2]
    x0 = xt_ref[0].astype(jnp.float32)   # (sb, 128), read straight off the ref
    x1 = xt_ref[1].astype(jnp.float32)   # (astype is a no-op for f32 inputs)
    out_ref[...] = x0 * w0 + x1 * w1 + bc    # dense (sb, 128) tile, unmasked vst


def _collapse_params(params):
    """Fold the three activation-free Linears into [w0, w1, bc] (runs once in XLA)."""
    hi = jax.lax.Precision.HIGHEST   # keep the tiny folds in true f32 precision
    w1, b1 = params["w1"], params["b1"]
    w2, b2 = params["w2"], params["b2"]
    w3, b3 = params["w3"], params["b3"]
    wc = jnp.dot(jnp.dot(w1, w2, precision=hi), w3, precision=hi)             # [2, 1]
    bc = jnp.dot(jnp.dot(b1, w2, precision=hi) + b2, w3, precision=hi) + b3   # [1, 1]
    return jnp.concatenate([wc.reshape(2), bc.reshape(1)]).astype(jnp.float32)  # [3]


def _choose_tiling(batch):
    """Pick (sublanes_per_tile, padded_sublane_count) for a given batch size."""
    s = pl.cdiv(batch, _LANE)                     # 128-wide batch rows needed
    n_steps = max(2, pl.cdiv(s, _MAX_SUBLANES))   # >= 2 steps so v7x uses both TCs
    sb = max(_SUBLANE, pl.cdiv(pl.cdiv(s, n_steps), _SUBLANE) * _SUBLANE)
    sb = min(sb, _MAX_SUBLANES)                   # caps padding waste to <= sb rows
    s_pad = pl.cdiv(s, sb) * sb
    return sb, s_pad


def circle_model_v1_forward(x, params, block_sublanes=None):
    """Forward pass of CircleModelV1 via a fused Pallas kernel.

    x: [B, 2] float32 (bfloat16 also accepted; upcast to f32 inside the kernel)
    params: dict with w1 [2,10], b1 [1,10], w2 [10,10], b2 [1,10], w3 [10,1], b3 [1,1]
            (weights stored as [in, out], i.e. transposed vs PyTorch's [out, in])
    returns: [B, 1] float32 raw logits == layer3(layer2(layer1(x)))
    """
    B = x.shape[0]
    wb = _collapse_params(params)

    if block_sublanes is None:
        sb, s_pad = _choose_tiling(B)
    else:
        sb = max(_SUBLANE, (block_sublanes // _SUBLANE) * _SUBLANE)
        s_pad = pl.cdiv(pl.cdiv(B, _LANE), sb) * sb
    b_pad = s_pad * _LANE
    grid = (s_pad // sb,)

    # Feature-major layout with the batch dense over (sublane, lane); the two
    # reshapes are contiguous (free) in XLA.
    # TODO(synk): the [B,2] -> [2,B] transpose is a separate HBM pass; accepting a
    # feature-major [2,B] input upstream would remove it for large batches.
    xt = jnp.transpose(x)                               # [2, B]
    if b_pad != B:
        xt = jnp.pad(xt, ((0, 0), (0, b_pad - B)))
    xt = xt.reshape(2, s_pad, _LANE)

    x_bytes = 2 * sb * _LANE * xt.dtype.itemsize
    o_bytes = sb * _LANE * 4
    vmem_limit = int(max(16 << 20, 4 * (x_bytes + o_bytes)))  # double-buffered + headroom

    out = pl.pallas_call(
        _affine_kernel,
        out_shape=jax.ShapeDtypeStruct((s_pad, _LANE), jnp.float32),
        grid=grid,
        in_specs=[
            pl.BlockSpec(memory_space=pltpu.MemorySpace.SMEM),   # [w0, w1, bc] scalars
            pl.BlockSpec((2, sb, _LANE), lambda i: (0, i, 0)),   # x tile: all 8 sublanes full
        ],
        out_specs=pl.BlockSpec((sb, _LANE), lambda i: (i, 0)),   # dense output tile
        compiler_params=pltpu.CompilerParams(
            dimension_semantics=("parallel",),   # lets v7x shard the batch over both TCs
            vmem_limit_bytes=vmem_limit,
        ),
    )(wb, xt)

    return out.reshape(-1)[:B].reshape(B, 1)


def init_params(key):
    """Deterministic init mirroring nn.Linear's U(-1/sqrt(fan_in), 1/sqrt(fan_in)).

    Weights stored as [in_features, out_features] so the math is x @ W + b.
    """
    def linear(key, fan_in, fan_out):
        kw, kb = jax.random.split(key)
        bound = 1.0 / jnp.sqrt(jnp.float32(fan_in))
        w = jax.random.uniform(kw, (fan_in, fan_out), jnp.float32, -bound, bound)
        b = jax.random.uniform(kb, (1, fan_out), jnp.float32, -bound, bound)
        return w, b

    k1, k2, k3 = jax.random.split(key, 3)
    w1, b1 = linear(k1, 2, 10)
    w2, b2 = linear(k2, 10, 10)
    w3, b3 = linear(k3, 10, 1)
    return {"w1": w1, "b1": b1, "w2": w2, "b2": b2, "w3": w3, "b3": b3}


def _reference(x, p):
    hi = jax.lax.Precision.HIGHEST
    h = jnp.dot(x, p["w1"], precision=hi) + p["b1"]
    h = jnp.dot(h, p["w2"], precision=hi) + p["b2"]
    return jnp.dot(h, p["w3"], precision=hi) + p["b3"]


if __name__ == "__main__":
    key = jax.random.PRNGKey(0)
    k_params, k_x1, k_x2 = jax.random.split(key, 3)

    params = init_params(k_params)

    # Small demo batch (circle dataset: 2-D points).
    B = 8
    x = jax.random.normal(k_x1, (B, 2), jnp.float32)
    out = jax.block_until_ready(circle_model_v1_forward(x, params))
    assert out.shape == (B, 1)
    assert jnp.allclose(out, _reference(x, params), atol=1e-5, rtol=1e-5)

    # Exercise a multi-step, pipelined grid with a ragged (padded) batch.
    B2 = 2500
    x2 = jax.random.normal(k_x2, (B2, 2), jnp.float32)
    out2 = jax.block_until_ready(
        circle_model_v1_forward(x2, params, block_sublanes=8))
    assert out2.shape == (B2, 1)
    assert jnp.allclose(out2, _reference(x2, params), atol=1e-5, rtol=1e-5)

    print("KERNEL_OK")
</pallas_src>

<mosaic_0001>
module attributes {stable_mosaic.version = 11 : i64} {
  func.func @_affine_kernel(%arg0: i32, %arg1: memref<3xf32, #tpu.memory_space<smem>>, %arg2: memref<2x8x128xf32, #tpu.memory_space<vmem>>, %arg3: memref<8x128xf32, #tpu.memory_space<vmem>>) attributes {dimension_semantics = [#tpu.dimension_semantics<parallel>], iteration_bounds = array<i64: 1>, scalar_prefetch = 0 : i64, scratch_operands = 0 : i64, tpu.core_type = #tpu.core_type<tc>, window_params = [{transform_indices = @transform_0, window_bounds = array<i64: 3>}, {transform_indices = @transform_1, window_bounds = array<i64: 2, 8, 128>}, {transform_indices = @transform_2, window_bounds = array<i64: 8, 128>}]} {
    %c0 = arith.constant 0 : index
    %0 = memref.load %arg1[%c0] : memref<3xf32, #tpu.memory_space<smem>>
    %c1 = arith.constant 1 : index
    %1 = memref.load %arg1[%c1] : memref<3xf32, #tpu.memory_space<smem>>
    %c2 = arith.constant 2 : index
    %2 = memref.load %arg1[%c2] : memref<3xf32, #tpu.memory_space<smem>>
    %c0_0 = arith.constant 0 : index
    %c0_1 = arith.constant 0 : index
    %c0_2 = arith.constant 0 : index
    %3 = vector.load %arg2[%c0_0, %c0_1, %c0_2] : memref<2x8x128xf32, #tpu.memory_space<vmem>>, vector<1x8x128xf32>
    %4 = vector.shape_cast %3 : vector<1x8x128xf32> to vector<8x128xf32>
    %c1_3 = arith.constant 1 : index
    %c0_4 = arith.constant 0 : index
    %c0_5 = arith.constant 0 : index
    %5 = vector.load %arg2[%c1_3, %c0_4, %c0_5] : memref<2x8x128xf32, #tpu.memory_space<vmem>>, vector<1x8x128xf32>
    %6 = vector.shape_cast %5 : vector<1x8x128xf32> to vector<8x128xf32>
    %7 = vector.broadcast %0 : f32 to vector<8x128xf32>
    %8 = arith.mulf %4, %7 : vector<8x128xf32>
    %9 = vector.broadcast %1 : f32 to vector<8x128xf32>
    %10 = arith.mulf %6, %9 : vector<8x128xf32>
    %11 = arith.addf %8, %10 : vector<8x128xf32>
    %12 = vector.broadcast %2 : f32 to vector<8x128xf32>
    %13 = arith.addf %11, %12 : vector<8x128xf32>
    %c0_6 = arith.constant 0 : index
    %c0_7 = arith.constant 0 : index
    %14 = vector.load %arg3[%c0_6, %c0_7] : memref<8x128xf32, #tpu.memory_space<vmem>>, vector<8x128xf32>
    tpu.vector_store %arg3[%c0_6, %c0_7], %13 {strides = array<i32>} : memref<8x128xf32, #tpu.memory_space<vmem>>, vector<8x128xf32>,
    return
  }
  func.func @transform_0(%arg0: i32) -> i32 {
    %c0_i32 = arith.constant 0 : i32
    %c0_i32_0 = arith.constant 0 : i32
    return %c0_i32 : i32
  }
  func.func @transform_1(%arg0: i32) -> (i32, i32, i32) {
    %c0_i32 = arith.constant 0 : i32
    %c0_i32_0 = arith.constant 0 : i32
    %c0_i32_1 = arith.constant 0 : i32
    return %c0_i32, %arg0, %c0_i32_0 : i32, i32, i32
  }
  func.func @transform_2(%arg0: i32) -> (i32, i32) {
    %c0_i32 = arith.constant 0 : i32
    %c0_i32_0 = arith.constant 0 : i32
    return %arg0, %c0_i32 : i32, i32
  }
}

</mosaic_0001>

<bundles_post_ra>
// kernel: tpu_custom_call.1
= control target key start
LH: loop header
LB: loop body
LE: loop exit
PB: predicated region body
PF: predicated region fallthrough
CT: control target
= control target key end

     0   :  { %7 = vsyncpa [#allocation5], 0  ;;  %s190_s0 = inlined_call_operand.hbm [shape: f32[3], index: 0, kind: input, shape index: {}]   ;;  %s191_s1 = inlined_call_operand.hbm [shape: f32[2,8,128], index: 1, kind: input, shape index: {}]   ;;  %s192_s2 = inlined_call_operand.hbm [shape: f32[8,128], index: 2, kind: output, shape index: {}]  }
   0x1   :  { %8 = vsyncpa [#allocation3], 0 }
   0x2   :  { %9 = vsyncpa [#allocation4], 0  ;;  %s74_s11 = scalar_lea.hbm %s190_s0, 16 }
   0x3   :  { %p75_p0 = scmp.ne.s32.totalorder %s190_s0, %s74_s11  ;;  %p78_p1 = scmp.lt.u32.totalorder %s74_s11, %s190_s0 }
   0x5   :  { %p80_p2 = pnand %p78_p1, %p75_p0 }
   0x7   :  { %83 = shalt.err (!%p80_p2)
}
   0x8   :  { %s134_s16 = smov [#allocation2]   ;;  %s135_s19 = smov [#allocation6]  }
   0x9   :  { %17 = dma.hbm_to_smem %s190_s0, 16, %s134_s16, [#allocation5]  }
   0xa   :  { %s23_s20 = sshll.u32 %s135_s19, 4  ;;  %s84_s23 = scalar_lea.hbm %s191_s1, 256  ;;  %s24_s20 = int_to_ptr.vmem [resolvable:$true] %s23_s20 }
   0xb   :  { %p85_p3 = scmp.ne.s32.totalorder %s191_s1, %s84_s23  ;;  %p88_p4 = scmp.lt.u32.totalorder %s84_s23, %s191_s1 }
   0xd   :  { %p90_p5 = pnand %p88_p4, %p85_p3 }
   0xf   :  { %93 = shalt.err (!%p90_p5)
}
  0x10   :  { %s94_s28 = scalar_lea.vmem %s24_s20, 256  ;;  %p99_p7 = scmp.lt.s32.totalorder %s24_s20, %s24_s20 }
  0x11   :  { %p95_p6 = scmp.ne.s32.totalorder %s24_s20, %s94_s28  ;;  %p100_p8 = scmp.lt.s32.totalorder %s94_s28, %s94_s28 }
  0x13   :  { %p101_p9 = por %p100_p8, %p99_p7 }
  0x15   :  { %p102_p10 = pnand %p101_p9, %p95_p6 }
  0x17   :  { %105 = shalt.err (!%p102_p10)
}
  0x18   :  { %s136_s0 = smov 128   ;;  %s137_s29 = smov 8  }
  0x19   :  { %29 = dma.hbm_to_vmem [thread:$0]  %s191_s1, 256, %s24_s20, [#allocation3], %s136_s0, %s136_s0, %s137_s29  }
  0x1a   :  { %128 = dma.done.wait [#allocation5], 16  }
  0x1b   :  { %129 = vsyncadd [#allocation5], 4294967280 }
  0x1c   :  { %130 = dma.done.wait [#allocation3], 256  }
  0x1d   :  { %131 = vsyncadd [#allocation3], 4294967040 }
  0x1e   :  { %36 = sfence }
  0x1f   :  { %s37_s4 = sld [smem:[#allocation2]]  ;;  %s67_s5 = sld [smem:[#allocation2 + $0x1]]  ;;  %v40_v0 = vld [vmem:[#allocation6] sm:$0xff]  ;;  %v42_v1 = vld [vmem:[#allocation6 + $0x8] sm:$0xff] }
  0x20   :  { %s68_s6 = sld [smem:[#allocation2 + $0x2]]  ;;  %s138_s7 = smov [#allocation7]  }
  0x21   :  { %s57_s8 = sshll.u32 %s138_s7, 4  ;;  %s58_s8 = int_to_ptr.vmem [resolvable:$true] %s57_s8 }
  0x22   :  { %s106_s1 = scalar_lea.vmem %s58_s8, 128  ;;  %p111_p12 = scmp.lt.s32.totalorder %s58_s8, %s58_s8 }
  0x23   :  { %p107_p11 = scmp.ne.s32.totalorder %s58_s8, %s106_s1  ;;  %p112_p13 = scmp.lt.s32.totalorder %s106_s1, %s106_s1 }
  0x25   :  { %v43_v2 = vstv %s37_s4  ;;  %v45_v3 = vstv %s67_s5  ;;  %p113_p0 = por %p112_p13, %p111_p12 }
  0x26   :  { %v44_v4 = vmul.f32 %v43_v2, %v40_v0  ;;  %v46_v5 = vmul.f32 %v45_v3, %v42_v1  ;;  %v48_v6 = vstv %s68_s6 }
  0x27   :  { %p114_p1 = pnand %p113_p0, %p107_p11 }
  0x28   :  { %v47_v7 = vadd.f32 %v46_v5, %v44_v4 }
  0x2a   :  { %v49_v8 = vadd.f32 %v48_v6, %v47_v7 }
  0x2c   :  { %50 = vst [vmem:[#allocation7] sm:$0xff] %v49_v8 }
  0x2d   :  { %117 = shalt.err (!%p114_p1)
}
  0x2e   :  { %s118_s11 = scalar_lea.hbm %s192_s2, 128 }
  0x2f   :  { %p119_p2 = scmp.ne.s32.totalorder %s192_s2, %s118_s11  ;;  %p122_p3 = scmp.lt.u32.totalorder %s118_s11, %s192_s2 }
  0x31   :  { %p124_p4 = pnand %p122_p3, %p119_p2 }
  0x33   :  { %127 = shalt.err (!%p124_p4)
}
  0x34   :  { %60 = dma.vmem_to_hbm [thread:$0]  %s58_s8, 128, %s192_s2, [#allocation4]  }
  0x35   :  { %132 = dma.done.wait [#allocation4], 128  }
  0x36   :  { %133 = vsyncadd [#allocation4], 4294967168 }
  0x37   :  { %64 = vsyncpa [#allocation3], 1 }
  0x38   :  { %65 = vsyncpa [#allocation4], 1 }
  0x39   :  { %66 = vsyncpa [#allocation5], 1 }

</bundles_post_ra>
